<compile_context>
chip_gen: v5e
topology: v5e:2x2
jax: 0.10.0
libtpu: 0.0.40
codegen_flags: <defaults>
</compile_context>

<pallas_src>
import jax
import jax.numpy as jnp
from jax.experimental import pallas as pl
from jax.experimental.pallas import tpu as pltpu


# ---------------------------------------------------------------------------
# Kernels
# ---------------------------------------------------------------------------

def _permute_0231_kernel(x_ref, o_ref):
    """x_ref: (1, C, Th, W) -> o_ref: (1, Th*W, C) (lane-dense) or (1, Th, W, C)."""
    y = jnp.transpose(x_ref[...], (0, 2, 3, 1))          # (1, Th, W, C) via XLU
    if tuple(y.shape) != tuple(o_ref.shape):
        # Lane-dense path: collapse (Th, W) -> Th*W.  Only taken when C is a
        # multiple of 128, so the lane dim is preserved and the reshape is the
        # well-supported sublane-collapse (no data movement).
        y = y.reshape(o_ref.shape)
    o_ref[...] = y


def _make_leadfixed_kernel(inner_perm):
    """Generic batch-first permutation: transpose one batch slice per step."""
    perm = (0,) + tuple(d + 1 for d in inner_perm)

    def kernel(x_ref, o_ref):
        o_ref[...] = jnp.transpose(x_ref[...], perm)

    return kernel


def _make_full_kernel(perm):
    def kernel(x_ref, o_ref):
        o_ref[...] = jnp.transpose(x_ref[...], perm)

    return kernel


# ---------------------------------------------------------------------------
# Tiling helper
# ---------------------------------------------------------------------------

def _pick_h_tile(H, W, C, itemsize):
    """Largest multiple of 8 dividing H while keeping one (C, t_h, W) tile at
    ~<= 1 MiB (so in+out tiles x2 pipeline buffers stay far under v7x's 32 MiB
    default scoped-VMEM limit).  Falls back to the full H extent."""
    target_elems = (1 << 20) // max(itemsize, 1)
    cap = max(8, target_elems // max(C * W, 1))
    best = None
    t = 8
    while t <= H and t <= cap:
        if H % t == 0:
            best = t
        t += 8
    return best if best is not None else H


# ---------------------------------------------------------------------------
# Wrappers
# ---------------------------------------------------------------------------

def _permute_0231(x):
    """NCHW -> NHWC, tiled over (batch, H-slabs)."""
    B, C, H, W = x.shape
    itemsize = x.dtype.itemsize
    t_h = _pick_h_tile(H, W, C, itemsize)
    grid = (B, H // t_h)

    in_spec = pl.BlockSpec((1, C, t_h, W), lambda b, j: (b, 0, j, 0))

    lane_dense = (C % 128 == 0)
    if lane_dense:
        # Declare output as (B, H*W, C): store last dim is C (full 128-lane
        # vst for swin's C=128).  Reshape back to NHWC afterwards is free.
        out_shape = jax.ShapeDtypeStruct((B, H * W, C), x.dtype)
        out_spec = pl.BlockSpec((1, t_h * W, C), lambda b, j: (b, j, 0))
    else:
        out_shape = jax.ShapeDtypeStruct((B, H, W, C), x.dtype)
        out_spec = pl.BlockSpec((1, t_h, W, C), lambda b, j: (b, j, 0, 0))

    cost = pl.CostEstimate(
        flops=0,
        transcendentals=0,
        bytes_accessed=2 * x.size * itemsize,
    )

    out = pl.pallas_call(
        _permute_0231_kernel,
        out_shape=out_shape,
        grid=grid,
        in_specs=[in_spec],
        out_specs=out_spec,
        compiler_params=pltpu.CompilerParams(
            dimension_semantics=("parallel", "parallel")
        ),
        cost_estimate=cost,
    )(x)

    if lane_dense:
        out = jnp.reshape(out, (B, H, W, C))
    return out


def _permute_batch_first(x, dims):
    """Fallback: any permutation with dims[0] == 0; one batch slice per step."""
    B = x.shape[0]
    in_rest = x.shape[1:]
    out_full = tuple(x.shape[d] for d in dims)
    out_rest = out_full[1:]
    inner_perm = tuple(d - 1 for d in dims[1:])
    n_in, n_out = len(in_rest), len(out_rest)

    cost = pl.CostEstimate(
        flops=0, transcendentals=0, bytes_accessed=2 * x.size * x.dtype.itemsize
    )

    return pl.pallas_call(
        _make_leadfixed_kernel(inner_perm),
        out_shape=jax.ShapeDtypeStruct(out_full, x.dtype),
        grid=(B,),
        in_specs=[pl.BlockSpec((1,) + in_rest, lambda b: (b,) + (0,) * n_in)],
        out_specs=pl.BlockSpec((1,) + out_rest, lambda b: (b,) + (0,) * n_out),
        compiler_params=pltpu.CompilerParams(dimension_semantics=("parallel",)),
        cost_estimate=cost,
    )(x)


def _permute_whole(x, dims):
    """Last-resort fallback for permutations that move the batch axis.
    The whole tensor is staged through VMEM (fine for the small shapes this
    test uses)."""
    out_full = tuple(x.shape[d] for d in dims)
    return pl.pallas_call(
        _make_full_kernel(dims),
        out_shape=jax.ShapeDtypeStruct(out_full, x.dtype),
    )(x)


def permute_pallas(x, dims):
    """aten.permute.default(x, dims) via Pallas TPU kernels."""
    dims = tuple(int(d) for d in dims)
    assert sorted(dims) == list(range(x.ndim)), "dims must be a permutation"

    if dims == tuple(range(x.ndim)):
        return x                                   # identity permute
    if x.ndim == 4 and dims == (0, 2, 3, 1):
        return _permute_0231(x)                    # swin_v2_b hot path
    if dims[0] == 0:
        return _permute_batch_first(x, dims)
    return _permute_whole(x, dims)


# ---------------------------------------------------------------------------
# Demo / self-test
# ---------------------------------------------------------------------------

if __name__ == "__main__":
    dims = (0, 2, 3, 1)  # NCHW -> NHWC, swin_v2_b's Permute([0, 2, 3, 1])

    # Small generic case (exercises the C < 128 path).
    x = jax.random.normal(jax.random.PRNGKey(0), (2, 4, 16, 16), dtype=jnp.float32)
    out = jax.block_until_ready(permute_pallas(x, dims))
    ref = jnp.transpose(x, dims)
    assert out.shape == ref.shape, (out.shape, ref.shape)
    assert out.dtype == ref.dtype
    assert jnp.array_equal(out, ref), "permute mismatch vs reference (C=4 path)"

    # Swin-like case (C = 128): exercises the lane-dense (B, H*W, C) path.
    x2 = jax.random.normal(jax.random.PRNGKey(0), (2, 128, 8, 8), dtype=jnp.float32)
    out2 = jax.block_until_ready(permute_pallas(x2, dims))
    ref2 = jnp.transpose(x2, dims)
    assert out2.shape == ref2.shape, (out2.shape, ref2.shape)
    assert jnp.array_equal(out2, ref2), "permute mismatch vs reference (C=128 path)"

    print("KERNEL_OK")
</pallas_src>

<mosaic_0001>
module attributes {stable_mosaic.version = 11 : i64} {
  func.func @_permute_0231_kernel(%arg0: i32, %arg1: i32, %arg2: memref<1x4x16x16xf32, #tpu.memory_space<vmem>>, %arg3: memref<1x16x16x4xf32, #tpu.memory_space<vmem>>) attributes {dimension_semantics = [#tpu.dimension_semantics<parallel>, #tpu.dimension_semantics<parallel>], iteration_bounds = array<i64: 2, 1>, scalar_prefetch = 0 : i64, scratch_operands = 0 : i64, tpu.core_type = #tpu.core_type<tc>, window_params = [{transform_indices = @transform_0, window_bounds = array<i64: 1, 4, 16, 16>}, {transform_indices = @transform_1, window_bounds = array<i64: 1, 16, 16, 4>}]} {
    %c0 = arith.constant 0 : index
    %c0_0 = arith.constant 0 : index
    %c0_1 = arith.constant 0 : index
    %c0_2 = arith.constant 0 : index
    %0 = vector.load %arg2[%c0, %c0_0, %c0_1, %c0_2] : memref<1x4x16x16xf32, #tpu.memory_space<vmem>>, vector<1x4x16x16xf32>
    %1 = tpu.transpose %0, [0, 2, 3, 1] : vector<1x4x16x16xf32> -> vector<1x16x16x4xf32>
    %c0_3 = arith.constant 0 : index
    %c0_4 = arith.constant 0 : index
    %c0_5 = arith.constant 0 : index
    %c0_6 = arith.constant 0 : index
    %2 = vector.load %arg3[%c0_3, %c0_4, %c0_5, %c0_6] : memref<1x16x16x4xf32, #tpu.memory_space<vmem>>, vector<1x16x16x4xf32>
    tpu.vector_store %arg3[%c0_3, %c0_4, %c0_5, %c0_6], %1 {strides = array<i32>} : memref<1x16x16x4xf32, #tpu.memory_space<vmem>>, vector<1x16x16x4xf32>,
    return
  }
  func.func @transform_0(%arg0: i32, %arg1: i32) -> (i32, i32, i32, i32) {
    %c0_i32 = arith.constant 0 : i32
    %c0_i32_0 = arith.constant 0 : i32
    %c0_i32_1 = arith.constant 0 : i32
    return %arg0, %c0_i32, %arg1, %c0_i32_0 : i32, i32, i32, i32
  }
  func.func @transform_1(%arg0: i32, %arg1: i32) -> (i32, i32, i32, i32) {
    %c0_i32 = arith.constant 0 : i32
    %c0_i32_0 = arith.constant 0 : i32
    %c0_i32_1 = arith.constant 0 : i32
    return %arg0, %arg1, %c0_i32, %c0_i32_0 : i32, i32, i32, i32
  }
}

</mosaic_0001>

<bundles_post_ra>
// kernel: tpu_custom_call.1
= control target key start
LH: loop header
LB: loop body
LE: loop exit
PB: predicated region body
PF: predicated region fallthrough
CT: control target
= control target key end

     0   :  { %6 = vsyncpa [#allocation3], 0  ;;  %s2122_s0 = inlined_call_operand.hbm [shape: f32[2,4,16,16], index: 0, kind: input, shape index: {}]   ;;  %s2123_s1 = inlined_call_operand.vmem [shape: f32[2,16,16,4], index: 1, kind: output, shape index: {}]  }
   0x1   :  { %8 = vsyncpa [#allocation3 + $0x1], 0  ;;  %s1683_s6 = smov 0   ;;  %s1685_s7 = smov 0  }
   0x2   :  { %s1687_s8 = smov 0   ;;  %s1689_s9 = smov 0  }
   0x3   :  { %s1691_s10 = smov 0   ;;  %s1693_s11 = smov 0  }
   0x4 LB: > { %s1512_s12 = sadd.s32 4294967295, %s1667_s11   ;;  %s26_s13 = sadd.s32 1, %s1663_s10  ;;  %s1667_s11 = sphi %s1693_s11, %s14_s11   ;;  %s1663_s10 = sphi %s1691_s10, %s2130_s10   ;;  %s1659_s9 = sphi %s1689_s9, %s2129_s9   ;;  %s1655_s8 = sphi %s1687_s8, %s2128_s8   ;;  %s1651_s7 = sphi %s1685_s7, %s2127_s7   ;;  %s1647_s6 = sphi %s1683_s6, %s2126_s6  }
   0x5   : > { %p28_p0 = scmp.ge.s32.totalorder %s26_s13, 2  ;;  %s35_s14 = sadd.s32 1, %s1655_s8 }
   0x6   : > { %p42_p1 = scmp.ne.s32.totalorder %s1655_s8, %s1651_s7  ;;  %p43_p2 = scmp.eq.s32.totalorder %s1667_s11, 0 }
   0x7   : > { %s2132_s13 = smov (%p28_p0, %s26_s13), 0  ;;  %p48_p4 = scmp.ne.s32.totalorder %s1651_s7, %s1647_s6 }
   0x8   : > { %p1719_p3 = por %p43_p2, %p42_p1  ;;  %s30_s16 = ssub.s32 %s1663_s10, %s2132_s13 }
   0x9   : > { %p49_p5 = scmp.eq.s32.totalorder %s1512_s12, 0  ;;  %p33_p6 = scmp.eq.s32.totalorder %s30_s16, 0 }
   0xa   : > { %p1533_p8 = scmp.lt.s32.totalorder %s1667_s11, 2  ;;  %s100_s19 = sand.u32 1, %s1655_s8  }
   0xb   : > { %p1726_p7 = por %p49_p5, %p48_p4  ;;  %s1525_s20 = sshll.u32 %s1663_s10, 6 }
   0xc   : > { %s1732_s18 = scalar_select %p33_p6, %s1655_s8, %s35_s14  }
   0xd   : > { %s1516_s21 = sshll.u32 %s100_s19, 6  ;;  %s111_s24 = scalar_lea.hbm %s2122_s0, %s1525_s20 }
   0xe   : > { %s112_s25 = sshll.u32 %s111_s24, 4  ;;  %s104_s26 = scalar_lea.vmem [#allocation2], %s1516_s21  ;;  %s113_s25 = int_to_ptr.hbm [resolvable:$true] %s112_s25 }
   0xf   : > { %s114_s27 = sshll.u32 %s104_s26, 4  ;;  %p1530_p9 = pnand %p1533_p8, %p1719_p3  ;;  %s115_s27 = int_to_ptr.vmem [resolvable:$true] %s114_s27 }
  0x10   : > { %p1519_p10 = scmp.ge.s32.totalorder %s1667_s11, 1  ;;  %p122_p11 = scmp.lt.s32.totalorder %s1667_s11, 3 }
  0x11   : > { %s101_s28 = scalar_lea.sflag [#allocation3], %s100_s19  ;;  %s1669_s29 = smov 128  }
  0x12   : > { %s1670_s30 = smov 8   ;;  %p123_p12 = pnand %p1519_p10, %p122_p11 }
  0x13   : > { %1532 = dma.hbm_to_vmem [thread:$0]  (!%p1530_p9), %s113_s25, 1024, %s115_s27, %s101_s28, %s1669_s29, %s1669_s29, %s1670_s30  }
  0x14   : > { %126 = sbr.rel (%p123_p12) target bundleno = 488 (0x1e8), region = 24  ;;  %s128_s2 = sand.u32 (!%p123_p12), 1, %s1651_s7  }
  0x15   : > { %s1520_s3 = sshll.u32 (!%p123_p12), %s128_s2, 6  ;;  %s129_s4 = scalar_lea.sflag (!%p123_p12), [#allocation3], %s128_s2 }
  0x16   : > { %s132_s5 = scalar_lea.vmem (!%p123_p12), [#allocation2], %s1520_s3 }
  0x19   : > { %1642 = dma.done.wait (%p1726_p7), %s129_s4, 1024  }
  0x1a   : > { %1644 = vsyncadd (%p1726_p7), %s129_s4, 4294966272  ;;  %v169_v0 = vld [vmem:[%s132_s5] sm:$0xff]  ;;  %v171_v2 = vld [vmem:[%s132_s5 + $0x10] sm:$0xff]  ;;  %v1671_v12 = vmov 1983009808   ;;  %vm306_vm0 = vcmask 1047556  }
  0x1b   : > { %v173_v1 = vld [vmem:[%s132_s5 + $0x20] sm:$0xff]  ;;  %177 = vxpose.xlu0.b32.start [1/2] (short) (narrow) %v169_v0, 16  ;;  %209 = vxpose.xlu1.b32.start [1/2] (short) (narrow) %v171_v2, 16  ;;  %v170_v3 = vld [vmem:[%s132_s5 + $0x8] sm:$0xff]  ;;  %v172_v5 = vld [vmem:[%s132_s5 + $0x18] sm:$0xff]  ;;  %v311_v13 = vunpack.c.l.s4 %v1671_v12  ;;  %p159_p13 = scmp.lt.s32.totalorder %s1659_s9, 1 }
  0x1c   : > { %241 = vxpose.xlu2.b32.start [1/2] (short) (narrow) %v173_v1, 16  ;;  %v174_v4 = vld [vmem:[%s132_s5 + $0x28] sm:$0xff]  ;;  %v175_v6 = vld [vmem:[%s132_s5 + $0x30] sm:$0xff]  ;;  %v176_v7 = vld [vmem:[%s132_s5 + $0x38] sm:$0xff]  ;;  %v1672_v22 = vmov 1934713408  }
  0x1d   : > { %v1750_v17 = vunpack.c.0.s8 %v311_v13  ;;  %v335_v23 = vunpack.c.l.s4 %v1672_v22  ;;  %s2134_s9 = smov (!%p159_p13, %s1659_s9), 1  ;;  %vm1378_vm1 = vcmask 31744  }
  0x1e   : > { %s1526_s6 = sshll.u32 %s2134_s9, 8 }
  0x1f   : > { %v1759_v30 = vunpack.c.0.s8 %v335_v23  ;;  %s1877_s14 = scalar_lea.vmem %s2123_s1, %s1526_s6 }
  0x23   : > { %178 = vxpose.xlu0.b32.end [2/2] (short) (narrow) %v170_v3, 16  ;;  %210 = vxpose.xlu1.b32.end [2/2] (short) (narrow) %v172_v5, 16 }
  0x24   : > { %242 = vxpose.xlu2.b32.end [2/2] (short) (narrow) %v174_v4, 16 }
  0x2b   : > { %273 = vxpose.xlu0.b32.start [1/2] (short) (narrow) %v175_v6, 16 }
  0x33   : > { %274 = vxpose.xlu0.b32.end [2/2] (short) (narrow) %v176_v7, 16 }
  0xb5   : > { %v257_v11 = vpop.trf.xlu2 }
  0xb6   : > { %v305_v16 = vrot.slane %v257_v11, 4 }
  0xbd   : > { %v258_v45 = vpop.trf.xlu2 }
  0xbe   : > { %v362_v50 = vrot.slane %v258_v45, 4 }
  0xbf   : > { %v193_v8 = vpop.trf.xlu0  ;;  %v225_v10 = vpop.trf.xlu1 }
  0xc0   : > { %v308_v14 = vrot.slane %v193_v8, 4  ;;  %v320_v15 = vrot.slane %v225_v10, 4  ;;  %v307_v25 = vsel %vm306_vm0, %v305_v16, %v193_v8 }
  0xc1   : > { %v313_v31 = vperm.slane %v307_v25, %v1750_v17 }
  0xc2   : > { %v309_v19 = vsel %vm306_vm0, %v257_v11, %v308_v14 }
  0xc3   : > { %v317_v29 = vperm.slane %v309_v19, %v1750_v17  ;;  %v332_v39 = vrot.slane %v313_v31, 4 }
  0xc5   : > { %v344_v55 = vrot.slane %v317_v29, 4 }
  0xc7   : > { %v1748_v9 = vpop.trf.xlu0  ;;  %v226_v46 = vpop.trf.xlu1 }
  0xc8   : > { %v363_v53 = vsel %vm306_vm0, %v362_v50, %v1748_v9  ;;  %v376_v60 = vrot.slane %v226_v46, 4  ;;  %v364_v1 = vrot.slane %v1748_v9, 4 }
  0xc9   : > { %v369_v56 = vperm.slane %v363_v53, %v1750_v17 }
  0xca   : > { %v365_v6 = vsel %vm306_vm0, %v258_v45, %v364_v1 }
  0xcb   : > { %v388_v63 = vrot.slane %v369_v56, 4 }
  0xcf   : > { %v289_v18 = vpop.trf.xlu0 }
  0xd0   : > { %v318_v20 = vrot.slane %v289_v18, 4  ;;  %v321_v21 = vsel %vm306_vm0, %v289_v18, %v320_v15 }
  0xd1   : > { %v329_v24 = vperm.slane %v321_v21, %v1750_v17 }
  0xd2   : > { %v319_v26 = vsel %vm306_vm0, %v318_v20, %v225_v10  ;;  %v373_v10 = vperm.slane %v365_v6, %v1750_v17 }
  0xd3   : > { %v325_v27 = vperm.slane %v319_v26, %v1750_v17  ;;  %v342_v28 = vrot.slane %v329_v24, 4  ;;  %v345_v57 = vsel %vm306_vm0, %v329_v24, %v344_v55 }
  0xd4   : > { %v353_v59 = vperm.slane %v345_v57, %v1759_v30  ;;  %v400_v13 = vrot.slane %v373_v10, 4 }
  0xd5   : > { %v343_v32 = vsel %vm306_vm0, %v342_v28, %v317_v29  ;;  %v330_v33 = vrot.slane %v325_v27, 4  ;;  %v333_v41 = vsel %vm306_vm0, %v325_v27, %v332_v39 }
  0xd6   : > { %v349_v34 = vperm.slane %v343_v32, %v1759_v30  ;;  %v341_v44 = vperm.slane %v333_v41, %v1759_v30  ;;  %v360_v62 = vrot.slane %v353_v59, 4 }
  0xd7   : > { %v331_v35 = vsel %vm306_vm0, %v330_v33, %v313_v31  ;;  %v290_v40 = vpop.trf.xlu0 }
  0xd8   : > { %546 = vxpose.xlu0.b32.start.end [1/1] (short) (narrow) %v349_v34, 16  ;;  %v337_v36 = vperm.slane %v331_v35, %v1759_v30  ;;  %v358_v42 = vrot.slane %v349_v34, 4  ;;  %v374_v43 = vrot.slane %v290_v40, 4  ;;  %v356_v49 = vrot.slane %v341_v44, 4 }
  0xd9   : > { %v377_v0 = vsel %vm306_vm0, %v290_v40, %v376_v60  ;;  %v361_v2 = vsel %vm306_vm0, 0.0, %v360_v62 }
  0xda   : > { %418 = vxpose.xlu1.b32.start.end [1/1] (short) (narrow) %v337_v36, 16  ;;  %v354_v37 = vrot.slane %v337_v36, 4  ;;  %v359_v47 = vsel %vm306_vm0, 0.0, %v358_v42  ;;  %v375_v48 = vsel %vm306_vm0, %v374_v43, %v226_v46  ;;  %v357_v52 = vsel %vm306_vm0, 0.0, %v356_v49 }
  0xdb   : > { %v381_v51 = vperm.slane %v375_v48, %v1750_v17  ;;  %v385_v4 = vperm.slane %v377_v0, %v1750_v17 }
  0xdc   : > { %v355_v38 = vsel %vm306_vm0, 0.0, %v354_v37 }
  0xdd   : > { %450 = vxpose.xlu2.b32.start.end [1/1] (short) (narrow) %v355_v38, 16  ;;  %v386_v54 = vrot.slane %v381_v51, 4  ;;  %v389_v3 = vsel %vm306_vm0, %v381_v51, %v388_v63  ;;  %v398_v7 = vrot.slane %v385_v4, 4  ;;  %v401_v14 = vsel %vm306_vm0, %v385_v4, %v400_v13 }
  0xde   : > { %v397_v5 = vperm.slane %v389_v3, %v1759_v30  ;;  %v409_v16 = vperm.slane %v401_v14, %v1759_v30 }
  0xdf   : > { %v387_v58 = vsel %vm306_vm0, %v386_v54, %v369_v56  ;;  %v399_v11 = vsel %vm306_vm0, %v398_v7, %v373_v10 }
  0xe0   : > { %v393_v61 = vperm.slane %v387_v58, %v1759_v30  ;;  %v412_v8 = vrot.slane %v397_v5, 4  ;;  %v405_v9 = vperm.slane %v399_v11, %v1759_v30  ;;  %v416_v21 = vrot.slane %v409_v16, 4 }
  0xe2   : > { %v413_v12 = vsel %vm306_vm0, 0.0, %v412_v8  ;;  %v410_v15 = vrot.slane %v393_v61, 4  ;;  %v414_v18 = vrot.slane %v405_v9, 4  ;;  %v417_v22 = vsel %vm306_vm0, 0.0, %v416_v21 }
  0xe4   : > { %v411_v19 = vsel %vm306_vm0, 0.0, %v410_v15  ;;  %v415_v20 = vsel %vm306_vm0, 0.0, %v414_v18 }
  0xe8   : > { %578 = vxpose.xlu0.b32.start.end [1/1] (short) (narrow) %v359_v47, 16 }
  0xea   : > { %482 = vxpose.xlu1.b32.start.end [1/1] (short) (narrow) %v341_v44, 16 }
  0xed   : > { %514 = vxpose.xlu2.b32.start.end [1/1] (short) (narrow) %v357_v52, 16 }
  0xf8   : > { %674 = vxpose.xlu0.b32.start.end [1/1] (short) (narrow) %v393_v61, 16 }
  0xfa   : > { %610 = vxpose.xlu1.b32.start.end [1/1] (short) (narrow) %v353_v59, 16 }
  0xfd   : > { %642 = vxpose.xlu2.b32.start.end [1/1] (short) (narrow) %v361_v2, 16 }
 0x108   : > { %770 = vxpose.xlu0.b32.start.end [1/1] (short) (narrow) %v413_v12, 16 }
 0x10a   : > { %802 = vxpose.xlu1.b32.start.end [1/1] (short) (narrow) %v405_v9, 16 }
 0x10d   : > { %738 = vxpose.xlu2.b32.start.end [1/1] (short) (narrow) %v397_v5, 16 }
 0x118   : > { %866 = vxpose.xlu0.b32.start.end [1/1] (short) (narrow) %v409_v16, 16 }
 0x11a   : > { %706 = vxpose.xlu1.b32.start.end [1/1] (short) (narrow) %v411_v19, 16 }
 0x11d   : > { %834 = vxpose.xlu2.b32.start.end [1/1] (short) (narrow) %v415_v20, 16 }
 0x12a   : > { %898 = vxpose.xlu1.b32.start.end [1/1] (short) (narrow) %v417_v22, 16 }
 0x176   : > { %v466_v23 = vpop.trf.xlu2 }
 0x177   : > { %v944_v31 = vrot.slane %v466_v23, 4 }
 0x17c   : > { %v1796_v24 = vpop.trf.xlu0 }
 0x17d   : > { %v956_v19 = vrot.slane %v1796_v24, 4 }
 0x17e   : > { %v434_v25 = vpop.trf.xlu1  ;;  %v467_v26 = vpop.trf.xlu2 }
 0x17f   : > { %v932_v36 = vrot.slane %v434_v25, 4  ;;  %v1168_v37 = vrot.slane %v467_v26, 4 }
 0x184   : > { %v1798_v27 = vpop.trf.xlu0 }
 0x185   : > { %v1180_v20 = vrot.slane %v1798_v27, 4 }
 0x186   : > { %v435_v28 = vpop.trf.xlu1  ;;  %v530_v29 = vpop.trf.xlu2 }
 0x187   : > { %v942_v32 = vrot.slane %v530_v29, 4  ;;  %v945_v33 = vsel %vm306_vm0, %v530_v29, %v944_v31  ;;  %v1156_v56 = vrot.slane %v435_v28, 4 }
 0x188   : > { %v953_v38 = vperm.slane %v945_v33, %v1750_v17 }
 0x189   : > { %v943_v34 = vsel %vm306_vm0, %v942_v32, %v466_v23 }
 0x18a   : > { %v949_v41 = vperm.slane %v943_v34, %v1750_v17  ;;  %v990_v47 = vrot.slane %v953_v38, 4 }
 0x18c   : > { %v594_v35 = vpop.trf.xlu0  ;;  %v978_v49 = vrot.slane %v949_v41, 4 }
 0x18d   : > { %v968_v53 = vrot.slane %v594_v35, 4 }
 0x18e   : > { %v498_v39 = vpop.trf.xlu1  ;;  %v531_v40 = vpop.trf.xlu2 }
 0x18f   : > { %v930_v42 = vrot.slane %v498_v39, 4  ;;  %v933_v43 = vsel %vm306_vm0, %v498_v39, %v932_v36  ;;  %v1166_v44 = vrot.slane %v531_v40, 4  ;;  %v1169_v48 = vsel %vm306_vm0, %v531_v40, %v1168_v37 }
 0x190   : > { %v941_v45 = vperm.slane %v933_v43, %v1750_v17  ;;  %v1811_v55 = vperm.slane %v1169_v48, %v1750_v17 }
 0x191   : > { %v931_v46 = vsel %vm306_vm0, %v930_v42, %v434_v25  ;;  %v1167_v52 = vsel %vm306_vm0, %v1166_v44, %v467_v26 }
 0x192   : > { %v937_v50 = vperm.slane %v931_v46, %v1750_v17  ;;  %v992_v51 = vrot.slane %v941_v45, 4  ;;  %v991_v57 = vsel %vm306_vm0, %v990_v47, %v941_v45  ;;  %v1815_v58 = vperm.slane %v1167_v52, %v1750_v17 }
 0x193   : > { %v1823_v4 = vperm.slane %v991_v57, %v1759_v30  ;;  %v1214_v5 = vrot.slane %v1811_v55, 4 }
 0x194   : > { %v595_v54 = vpop.trf.xlu0  ;;  %v979_v61 = vsel %vm306_vm0, %v978_v49, %v937_v50  ;;  %v980_v62 = vrot.slane %v937_v50, 4  ;;  %v993_v63 = vsel %vm306_vm0, %v953_v38, %v992_v51  ;;  %v1202_v9 = vrot.slane %v1815_v58, 4 }
 0x195   : > { %v1828_v7 = vperm.slane %v979_v61, %v1759_v30  ;;  %v1831_v8 = vperm.slane %v993_v63, %v1759_v30  ;;  %v1192_v15 = vrot.slane %v595_v54, 4  ;;  %v1036_v21 = vrot.slane %v1823_v4, 4 }
 0x196   : > { %v499_v59 = vpop.trf.xlu1  ;;  %v658_v60 = vpop.trf.xlu2  ;;  %v981_v12 = vsel %vm306_vm0, %v949_v41, %v980_v62 }
 0x197   : > { %v1154_v0 = vrot.slane %v499_v59, 4  ;;  %v1157_v1 = vsel %vm306_vm0, %v499_v59, %v1156_v56  ;;  %v966_v2 = vrot.slane %v658_v60, 4  ;;  %v969_v3 = vsel %vm306_vm0, %v658_v60, %v968_v53 }
 0x198   : > { %v977_v11 = vperm.slane %v969_v3, %v1750_v17  ;;  %v1165_v14 = vperm.slane %v1157_v1, %v1750_v17  ;;  %v1851_v22 = vperm.slane %v981_v12, %v1759_v30  ;;  %v1028_v23 = vrot.slane %v1828_v7, 4 }
 0x199   : > { %v1155_v6 = vsel %vm306_vm0, %v1154_v0, %v435_v28  ;;  %v967_v10 = vsel %vm306_vm0, %v966_v2, %v594_v35  ;;  %v1040_v25 = vrot.slane %v1831_v8, 4 }
 0x19a   : > { %v1161_v13 = vperm.slane %v1155_v6, %v1750_v17  ;;  %v973_v16 = vperm.slane %v967_v10, %v1750_v17  ;;  %v1014_v26 = vrot.slane %v977_v11, 4  ;;  %v1215_v32 = vsel %vm306_vm0, %v1214_v5, %v1165_v14 }
 0x19b   : > { %v1216_v40 = vrot.slane %v1165_v14, 4  ;;  %v1032_v47 = vrot.slane %v1851_v22, 4  ;;  %v1872_v49 = vperm.slane %v1215_v32, %v1759_v30 }
 0x19c   : > { %v1840_v18 = vpop.trf.xlu0  ;;  %v1203_v31 = vsel %vm306_vm0, %v1202_v9, %v1161_v13  ;;  %v1002_v35 = vrot.slane %v973_v16, 4  ;;  %v1204_v39 = vrot.slane %v1161_v13, 4 }
 0x19d   : > { %v1869_v48 = vperm.slane %v1203_v31, %v1759_v30  ;;  %v1217_v62 = vsel %vm306_vm0, %v1811_v55, %v1216_v40 }
 0x19e   : > { %v626_v28 = vpop.trf.xlu1  ;;  %v659_v29 = vpop.trf.xlu2  ;;  %v1205_v61 = vsel %vm306_vm0, %v1815_v58, %v1204_v39 }
 0x19f   : > { %v954_v33 = vrot.slane %v626_v28, 4  ;;  %v957_v34 = vsel %vm306_vm0, %v626_v28, %v956_v19  ;;  %v1190_v37 = vrot.slane %v659_v29, 4  ;;  %v1193_v38 = vsel %vm306_vm0, %v659_v29, %v1192_v15 }
 0x1a0   : > { %v965_v36 = vperm.slane %v957_v34, %v1750_v17  ;;  %v1201_v42 = vperm.slane %v1193_v38, %v1750_v17  ;;  %v1252_v28 = vrot.slane %v1869_v48, 4 }
 0x1a1   : > { %v955_v41 = vsel %vm306_vm0, %v954_v33, %v1796_v24  ;;  %v1191_v46 = vsel %vm306_vm0, %v1190_v37, %v595_v54 }
 0x1a2   : > { %v961_v43 = vperm.slane %v955_v41, %v1750_v17  ;;  %v1015_v44 = vsel %vm306_vm0, %v1014_v26, %v965_v36  ;;  %v1016_v45 = vrot.slane %v965_v36, 4  ;;  %v1197_v53 = vperm.slane %v1191_v46, %v1750_v17 }
 0x1a3   : > { %v1021_v24 = vperm.slane %v1015_v44, %v1759_v30  ;;  %v1238_v0 = vrot.slane %v1201_v42, 4 }
 0x1a4   : > { %v1003_v50 = vsel %vm306_vm0, %v1002_v35, %v961_v43  ;;  %v1004_v51 = vrot.slane %v961_v43, 4  ;;  %v1017_v52 = vsel %vm306_vm0, %v977_v11, %v1016_v45  ;;  %v1883_v54 = vpop.trf.xlu0  ;;  %v1226_v55 = vrot.slane %v1197_v53, 4 }
 0x1a5   : > { %v1009_v56 = vperm.slane %v1003_v50, %v1759_v30  ;;  %v1025_v57 = vperm.slane %v1017_v52, %v1759_v30  ;;  %v1034_v59 = vrot.slane %v1021_v24, 4  ;;  %v1037_v60 = vsel %vm306_vm0, %v1021_v24, %v1036_v21 }
 0x1a6   : > { %v1005_v63 = vsel %vm306_vm0, %v973_v16, %v1004_v51  ;;  %1389 = vst.msk [vmem:[%s1877_s14 + $0x50] sm:$0xff] %vm1378_vm1, %v1037_v60  ;;  %v627_v1 = vpop.trf.xlu1  ;;  %v754_v39 = vpop.trf.xlu2  ;;  %v1044_v60 = vrot.slane %v1840_v18, 4 }
 0x1a7   : > { %v1013_v2 = vperm.slane %v1005_v63, %v1759_v30  ;;  %v1026_v3 = vrot.slane %v1009_v56, 4  ;;  %v1029_v5 = vsel %vm306_vm0, %v1009_v56, %v1028_v23  ;;  %v1035_v6 = vsel %vm306_vm0, %v1034_v59, %v1823_v4 }
 0x1a8   : > { %v1038_v58 = vrot.slane %v1025_v57, 4  ;;  %1381 = vst.msk [vmem:[%s1877_s14 + $0x10] sm:$0xff] %vm1378_vm1, %v1029_v5  ;;  %v1178_v10 = vrot.slane %v627_v1, 4  ;;  %v1181_v11 = vsel %vm306_vm0, %v627_v1, %v1180_v20  ;;  %v1213_v4 = vperm.slane %v1205_v61, %v1759_v30 }
 0x1a9   : > { %v1027_v12 = vsel %vm306_vm0, %v1026_v3, %v1828_v7  ;;  %v1030_v9 = vrot.slane %v1013_v2, 4  ;;  %v1033_v13 = vsel %vm306_vm0, %v1013_v2, %v1032_v47  ;;  %1387 = vst.msk [vmem:[%s1877_s14 + $0x40] sm:$0xff] %vm1378_vm1, %v1035_v6  ;;  %v1189_v14 = vperm.slane %v1181_v11, %v1750_v17 }
 0x1aa   : > { %v1039_v15 = vsel %vm306_vm0, %v1038_v58, %v1831_v8  ;;  %v1041_v16 = vsel %vm306_vm0, %v1025_v57, %v1040_v25  ;;  %1379 = vst.msk [vmem:[%s1877_s14] sm:$0xff] %vm1378_vm1, %v1027_v12  ;;  %v1179_v7 = vsel %vm306_vm0, %v1178_v10, %v1798_v27  ;;  %v1225_v8 = vperm.slane %v1217_v62, %v1759_v30 }
 0x1ab   : > { %v1031_v19 = vsel %vm306_vm0, %v1030_v9, %v1851_v22  ;;  %1385 = vst.msk [vmem:[%s1877_s14 + $0x30] sm:$0xff] %vm1378_vm1, %v1033_v13  ;;  %v1185_v20 = vperm.slane %v1179_v7, %v1750_v17  ;;  %v1239_v21 = vsel %vm306_vm0, %v1238_v0, %v1189_v14  ;;  %v1240_v23 = vrot.slane %v1189_v14, 4 }
 0x1ac   : > { %v1260_v25 = vrot.slane %v1872_v49, 4  ;;  %1383 = vst.msk [vmem:[%s1877_s14 + $0x20] sm:$0xff] %vm1378_vm1, %v1031_v19  ;;  %v1245_v27 = vperm.slane %v1239_v21, %v1759_v30  ;;  %v786_v26 = vpop.trf.xlu0  ;;  %v1256_v37 = vrot.slane %v1213_v4, 4  ;;  %v1264_v45 = vrot.slane %v1225_v8, 4 }
 0x1ad   : > { %1391 = vst.msk [vmem:[%s1877_s14 + $0x60] sm:$0xff] %vm1378_vm1, %v1039_v15  ;;  %v1227_v22 = vsel %vm306_vm0, %v1226_v55, %v1185_v20  ;;  %v1228_v29 = vrot.slane %v1185_v20, 4  ;;  %v1241_v31 = vsel %vm306_vm0, %v1201_v42, %v1240_v23  ;;  %v1054_v56 = vrot.slane %v786_v26, 4 }
 0x1ae   : > { %1393 = vst.msk [vmem:[%s1877_s14 + $0x70] sm:$0xff] %vm1378_vm1, %v1041_v16  ;;  %v1233_v32 = vperm.slane %v1227_v22, %v1759_v30  ;;  %v1249_v33 = vperm.slane %v1241_v31, %v1759_v30  ;;  %v1258_v34 = vrot.slane %v1245_v27, 4  ;;  %v1261_v35 = vsel %vm306_vm0, %v1245_v27, %v1260_v25  ;;  %v818_v36 = vpop.trf.xlu1 }
 0x1af   : > { %v1229_v38 = vsel %vm306_vm0, %v1197_v53, %v1228_v29  ;;  %1405 = vst.msk [vmem:[%s1877_s14 + $0xd0] sm:$0xff] %vm1378_vm1, %v1261_v35  ;;  %v755_v53 = vpop.trf.xlu2  ;;  %v1042_v57 = vrot.slane %v754_v39, 4  ;;  %v1268_v0 = vrot.slane %v1883_v54, 4  ;;  %v1045_v2 = vsel %vm306_vm0, %v754_v39, %v1044_v60 }
 0x1b0   : > { %v1237_v40 = vperm.slane %v1229_v38, %v1759_v30  ;;  %v1250_v41 = vrot.slane %v1233_v32, 4  ;;  %v1253_v42 = vsel %vm306_vm0, %v1233_v32, %v1252_v28  ;;  %v1259_v43 = vsel %vm306_vm0, %v1258_v34, %v1872_v49 }
 0x1b1   : > { %v1262_v44 = vrot.slane %v1249_v33, 4  ;;  %1397 = vst.msk [vmem:[%s1877_s14 + $0x90] sm:$0xff] %vm1378_vm1, %v1253_v42  ;;  %v1265_v49 = vsel %vm306_vm0, %v1249_v33, %v1264_v45  ;;  %v1043_v1 = vsel %vm306_vm0, %v1042_v57, %v1840_v18  ;;  %v1266_v3 = vrot.slane %v755_v53, 4 }
 0x1b2   : > { %v1251_v46 = vsel %vm306_vm0, %v1250_v41, %v1869_v48  ;;  %v1254_v47 = vrot.slane %v1237_v40, 4  ;;  %v1257_v24 = vsel %vm306_vm0, %v1237_v40, %v1256_v37  ;;  %1403 = vst.msk [vmem:[%s1877_s14 + $0xc0] sm:$0xff] %vm1378_vm1, %v1259_v43  ;;  %v1049_v55 = vperm.slane %v1043_v1, %v1750_v17 }
 0x1b3   : > { %v1263_v50 = vsel %vm306_vm0, %v1262_v44, %v1225_v8  ;;  %1395 = vst.msk [vmem:[%s1877_s14 + $0x80] sm:$0xff] %vm1378_vm1, %v1251_v46  ;;  %v1053_v11 = vperm.slane %v1045_v2, %v1750_v17  ;;  %v1269_v12 = vsel %vm306_vm0, %v755_v53, %v1268_v0  ;;  %v1068_v9 = vrot.slane %v818_v36, 4 }
 0x1b4   : > { %v1255_v51 = vsel %vm306_vm0, %v1254_v47, %v1213_v4  ;;  %1401 = vst.msk [vmem:[%s1877_s14 + $0xb0] sm:$0xff] %vm1378_vm1, %v1257_v24  ;;  %v787_v52 = vpop.trf.xlu0  ;;  %v1267_v18 = vsel %vm306_vm0, %v1266_v3, %v1883_v54  ;;  %v1092_v7 = vrot.slane %v1049_v55, 4  ;;  %v1979_v19 = vperm.slane %v1269_v12, %v1750_v17 }
 0x1b5   : > { %1399 = vst.msk [vmem:[%s1877_s14 + $0xa0] sm:$0xff] %vm1378_vm1, %v1255_v51  ;;  %v1278_v4 = vrot.slane %v787_v52, 4  ;;  %v1104_v23 = vrot.slane %v1053_v11, 4  ;;  %v1273_v8 = vperm.slane %v1267_v18, %v1750_v17 }
 0x1b6   : > { %1407 = vst.msk [vmem:[%s1877_s14 + $0xe0] sm:$0xff] %vm1378_vm1, %v1263_v50  ;;  %v819_v48 = vpop.trf.xlu1  ;;  %v1328_v33 = vrot.slane %v1979_v19, 4 }
 0x1b7   : > { %1409 = vst.msk [vmem:[%s1877_s14 + $0xf0] sm:$0xff] %vm1378_vm1, %v1265_v49  ;;  %v850_v6 = vpop.trf.xlu2  ;;  %v1292_v27 = vrot.slane %v819_v48, 4  ;;  %v1316_v45 = vrot.slane %v1273_v8, 4 }
 0x1b8   : > { %v1080_v35 = vrot.slane %v850_v6, 4 }
 0x1bc   : > { %v882_v59 = vpop.trf.xlu0 }
 0x1bd   : > { %v1066_v13 = vrot.slane %v882_v59, 4  ;;  %v1069_v20 = vsel %vm306_vm0, %v882_v59, %v1068_v9 }
 0x1be   : > { %v722_v61 = vpop.trf.xlu1  ;;  %v1077_v22 = vperm.slane %v1069_v20, %v1750_v17 }
 0x1bf   : > { %v1055_v62 = vsel %vm306_vm0, %v1054_v56, %v722_v61  ;;  %v1056_v63 = vrot.slane %v722_v61, 4  ;;  %v1991_v37 = vpop.trf.xlu2 }
 0x1c0   : > { %v1061_v58 = vperm.slane %v1055_v62, %v1750_v17  ;;  %v1128_v46 = vrot.slane %v1077_v22, 4  ;;  %v1304_v50 = vrot.slane %v1991_v37, 4 }
 0x1c1   : > { %v1057_v5 = vsel %vm306_vm0, %v786_v26, %v1056_v63  ;;  %v1067_v26 = vsel %vm306_vm0, %v1066_v13, %v818_v36 }
 0x1c2   : > { %v1065_v10 = vperm.slane %v1057_v5, %v1750_v17  ;;  %v1090_v15 = vrot.slane %v1061_v58, 4  ;;  %v1093_v54 = vsel %vm306_vm0, %v1061_v58, %v1092_v7  ;;  %v1073_v36 = vperm.slane %v1067_v26, %v1750_v17 }
 0x1c3   : > { %v1101_v38 = vperm.slane %v1093_v54, %v1759_v30 }
 0x1c4   : > { %v883_v14 = vpop.trf.xlu0  ;;  %v1102_v21 = vrot.slane %v1065_v10, 4  ;;  %v1091_v29 = vsel %vm306_vm0, %v1090_v15, %v1049_v55  ;;  %v1105_v31 = vsel %vm306_vm0, %v1065_v10, %v1104_v23  ;;  %v1116_v56 = vrot.slane %v1073_v36, 4 }
 0x1c5   : > { %v1290_v25 = vrot.slane %v883_v14, 4  ;;  %v1293_v40 = vsel %vm306_vm0, %v883_v14, %v1292_v27  ;;  %v1998_v41 = vperm.slane %v1091_v29, %v1759_v30  ;;  %v2001_v42 = vperm.slane %v1105_v31, %v1759_v30 }
 0x1c6   : > { %v723_v16 = vpop.trf.xlu1  ;;  %v1103_v34 = vsel %vm306_vm0, %v1102_v21, %v1053_v11  ;;  %v2011_v49 = vperm.slane %v1293_v40, %v1750_v17 }
 0x1c7   : > { %v1280_v28 = vrot.slane %v723_v16, 4  ;;  %v1279_v32 = vsel %vm306_vm0, %v1278_v4, %v723_v16  ;;  %v1291_v39 = vsel %vm306_vm0, %v1290_v25, %v819_v48  ;;  %v1109_v47 = vperm.slane %v1103_v34, %v1759_v30 }
 0x1c8   : > { %v1285_v44 = vperm.slane %v1279_v32, %v1750_v17  ;;  %v2008_v51 = vperm.slane %v1291_v39, %v1750_v17  ;;  %v1140_v60 = vrot.slane %v1998_v41, 4  ;;  %v1152_v61 = vrot.slane %v2001_v42, 4 }
 0x1c9   : > { %v1281_v43 = vsel %vm306_vm0, %v787_v52, %v1280_v28  ;;  %v1144_v52 = vrot.slane %v1101_v38, 4  ;;  %v1148_v5 = vrot.slane %v1109_v47, 4  ;;  %v1352_v55 = vrot.slane %v2011_v49, 4 }
 0x1ca   : > { %v1289_v57 = vperm.slane %v1281_v43, %v1750_v17  ;;  %v1314_v62 = vrot.slane %v1285_v44, 4  ;;  %v1317_v0 = vsel %vm306_vm0, %v1285_v44, %v1316_v45  ;;  %v1340_v58 = vrot.slane %v2008_v51, 4 }
 0x1cb   : > { %v1325_v18 = vperm.slane %v1317_v0, %v1759_v30 }
 0x1cc   : > { %v1326_v11 = vrot.slane %v1289_v57, 4  ;;  %v1315_v15 = vsel %vm306_vm0, %v1314_v62, %v1273_v8  ;;  %v1329_v16 = vsel %vm306_vm0, %v1289_v57, %v1328_v33 }
 0x1cd   : > { %v1337_v29 = vperm.slane %v1329_v16, %v1759_v30 }
 0x1ce   : > { %v914_v24 = vpop.trf.xlu1  ;;  %v1327_v54 = vsel %vm306_vm0, %v1326_v11, %v1979_v19  ;;  %v1321_v19 = vperm.slane %v1315_v15, %v1759_v30 }
 0x1cf   : > { %v1078_v48 = vrot.slane %v914_v24, 4  ;;  %v1081_v53 = vsel %vm306_vm0, %v914_v24, %v1080_v35  ;;  %v1333_v39 = vperm.slane %v1327_v54, %v1759_v30  ;;  %v1376_v45 = vrot.slane %v1337_v29, 4 }
 0x1d0   : > { %v1089_v59 = vperm.slane %v1081_v53, %v1750_v17  ;;  %v1364_v24 = vrot.slane %v1321_v19, 4 }
 0x1d1   : > { %v1079_v63 = vsel %vm306_vm0, %v1078_v48, %v850_v6  ;;  %v1372_v48 = vrot.slane %v1333_v39, 4 }
 0x1d2   : > { %v1085_v1 = vperm.slane %v1079_v63, %v1750_v17  ;;  %v1126_v2 = vrot.slane %v1089_v59, 4  ;;  %v1129_v3 = vsel %vm306_vm0, %v1089_v59, %v1128_v46 }
 0x1d3   : > { %v1137_v10 = vperm.slane %v1129_v3, %v1759_v30 }
 0x1d4   : > { %v1114_v12 = vrot.slane %v1085_v1, 4  ;;  %v1117_v9 = vsel %vm306_vm0, %v1085_v1, %v1116_v56  ;;  %v1127_v6 = vsel %vm306_vm0, %v1126_v2, %v1077_v22 }
 0x1d5   : > { %v1125_v13 = vperm.slane %v1117_v9, %v1759_v30  ;;  %v1133_v14 = vperm.slane %v1127_v6, %v1759_v30  ;;  %v1153_v4 = vsel %vm306_vm0, %v1137_v10, %v1152_v61  ;;  %v1150_v20 = vrot.slane %v1137_v10, 4 }
 0x1d6   : > { %v1115_v7 = vsel %vm306_vm0, %v1114_v12, %v1073_v36  ;;  %1394 = vst.msk [vmem:[%s1877_s14 + $0x78] sm:$0xff] %vm1378_vm1, %v1153_v4  ;;  %v915_v21 = vpop.trf.xlu1 }
 0x1d7   : > { %v1121_v23 = vperm.slane %v1115_v7, %v1759_v30  ;;  %v1142_v25 = vrot.slane %v1125_v13, 4  ;;  %v1145_v27 = vsel %vm306_vm0, %v1125_v13, %v1144_v52  ;;  %v1146_v26 = vrot.slane %v1133_v14, 4 }
 0x1d8   : > { %v1149_v8 = vsel %vm306_vm0, %v1133_v14, %v1148_v5  ;;  %1386 = vst.msk [vmem:[%s1877_s14 + $0x38] sm:$0xff] %vm1378_vm1, %v1145_v27  ;;  %v1302_v28 = vrot.slane %v915_v21, 4  ;;  %v1305_v22 = vsel %vm306_vm0, %v915_v21, %v1304_v50  ;;  %v1151_v40 = vsel %vm306_vm0, %v1150_v20, %v2001_v42 }
 0x1d9   : > { %v1138_v31 = vrot.slane %v1121_v23, 4  ;;  %v1141_v32 = vsel %vm306_vm0, %v1121_v23, %v1140_v60  ;;  %v1143_v33 = vsel %vm306_vm0, %v1142_v25, %v1101_v38  ;;  %1390 = vst.msk [vmem:[%s1877_s14 + $0x58] sm:$0xff] %vm1378_vm1, %v1149_v8  ;;  %v1147_v34 = vsel %vm306_vm0, %v1146_v26, %v1109_v47 }
 0x1da   : > { %1382 = vst.msk [vmem:[%s1877_s14 + $0x18] sm:$0xff] %vm1378_vm1, %v1141_v32  ;;  %v1303_v35 = vsel %vm306_vm0, %v1302_v28, %v1991_v37  ;;  %v1313_v36 = vperm.slane %v1305_v22, %v1750_v17  ;;  %v1368_v42 = vrot.slane %v1325_v18, 4 }
 0x1db   : > { %v1139_v38 = vsel %vm306_vm0, %v1138_v31, %v1998_v41  ;;  %1384 = vst.msk [vmem:[%s1877_s14 + $0x28] sm:$0xff] %vm1378_vm1, %v1143_v33  ;;  %v1309_v43 = vperm.slane %v1303_v35, %v1750_v17 }
 0x1dc   : > { %1380 = vst.msk [vmem:[%s1877_s14 + $0x8] sm:$0xff] %vm1378_vm1, %v1139_v38  ;;  %v1350_v44 = vrot.slane %v1313_v36, 4  ;;  %v1353_v37 = vsel %vm306_vm0, %v1313_v36, %v1352_v55 }
 0x1dd   : > { %1388 = vst.msk [vmem:[%s1877_s14 + $0x48] sm:$0xff] %vm1378_vm1, %v1147_v34  ;;  %v1338_v46 = vrot.slane %v1309_v43, 4  ;;  %v1341_v47 = vsel %vm306_vm0, %v1309_v43, %v1340_v58  ;;  %v1361_v41 = vperm.slane %v1353_v37, %v1759_v30 }
 0x1de   : > { %1392 = vst.msk [vmem:[%s1877_s14 + $0x68] sm:$0xff] %vm1378_vm1, %v1151_v40  ;;  %v1349_v17 = vperm.slane %v1341_v47, %v1759_v30  ;;  %v1351_v50 = vsel %vm306_vm0, %v1350_v44, %v2011_v49 }
 0x1df   : > { %v1339_v53 = vsel %vm306_vm0, %v1338_v46, %v2008_v51  ;;  %v1357_v56 = vperm.slane %v1351_v50, %v1759_v30  ;;  %v1377_v52 = vsel %vm306_vm0, %v1361_v41, %v1376_v45  ;;  %v1374_v61 = vrot.slane %v1361_v41, 4 }
 0x1e0   : > { %v1345_v57 = vperm.slane %v1339_v53, %v1759_v30  ;;  %v1366_v59 = vrot.slane %v1349_v17, 4  ;;  %v1369_v60 = vsel %vm306_vm0, %v1349_v17, %v1368_v42  ;;  %1410 = vst.msk [vmem:[%s1877_s14 + $0xf8] sm:$0xff] %vm1378_vm1, %v1377_v52 }
 0x1e1   : > { %v1370_v49 = vrot.slane %v1357_v56, 4  ;;  %v1373_v51 = vsel %vm306_vm0, %v1357_v56, %v1372_v48  ;;  %1402 = vst.msk [vmem:[%s1877_s14 + $0xb8] sm:$0xff] %vm1378_vm1, %v1369_v60  ;;  %v1375_v2 = vsel %vm306_vm0, %v1374_v61, %v1337_v29 }
 0x1e2   : > { %v1362_v62 = vrot.slane %v1345_v57, 4  ;;  %v1365_v63 = vsel %vm306_vm0, %v1345_v57, %v1364_v24  ;;  %v1367_v30 = vsel %vm306_vm0, %v1366_v59, %v1325_v18  ;;  %1406 = vst.msk [vmem:[%s1877_s14 + $0xd8] sm:$0xff] %vm1378_vm1, %v1373_v51 }
 0x1e3   : > { %v1371_v0 = vsel %vm306_vm0, %v1370_v49, %v1333_v39  ;;  %1398 = vst.msk [vmem:[%s1877_s14 + $0x98] sm:$0xff] %vm1378_vm1, %v1365_v63 }
 0x1e4   : > { %v1363_v1 = vsel %vm306_vm0, %v1362_v62, %v1321_v19  ;;  %1400 = vst.msk [vmem:[%s1877_s14 + $0xa8] sm:$0xff] %vm1378_vm1, %v1367_v30 }
 0x1e5   : > { %1396 = vst.msk [vmem:[%s1877_s14 + $0x88] sm:$0xff] %vm1378_vm1, %v1363_v1 }
 0x1e6   : > { %1404 = vst.msk [vmem:[%s1877_s14 + $0xc8] sm:$0xff] %vm1378_vm1, %v1371_v0 }
 0x1e7   : > { %1408 = vst.msk [vmem:[%s1877_s14 + $0xe8] sm:$0xff] %vm1378_vm1, %v1375_v2 }
 0x1e8 PF: > { %s14_s11 = sadd.s32 1, %s1667_s11   ;;  %s2126_s6 = smov %s1651_s7 }
 0x1e9   : > { %p11_p0 = scmp.ge.s32.totalorder %s14_s11, 4   ;;  %s2127_s7 = smov %s1655_s8 }
 0x1ea   : > { %s2128_s8 = smov %s1732_s18  ;;  %s2129_s9 = smov %s1663_s10 }
 0x1eb   : > { %s2130_s10 = smov %s2132_s13  ;;  %13 = sbr.rel (!%p11_p0) target bundleno = 4 (0x4), region = 64 }
 0x1f0   :  { %1443 = vsyncpa [#allocation3], 1 }
 0x1f1   :  { %1445 = vsyncpa [#allocation3 + $0x1], 1 }

</bundles_post_ra>
